<compile_context>
chip_gen: v5e
topology: v5e:2x2
jax: 0.10.0
libtpu: 0.0.40
codegen_flags: <defaults>
</compile_context>

<pallas_src>
import jax
import jax.numpy as jnp
from jax.experimental import pallas as pl
from jax.experimental.pallas import tpu as pltpu

LANE = 128      # TPU lane width (last dim)
SUBLANE = 8     # f32 sublanes per vreg (second-to-last dim)
NEG_BIG = -1e30  # bias for padded output lanes -> exp underflows to exactly 0


def _round_up(x, m):
    return ((x + m - 1) // m) * m


def rnn_seq_kernel(x_ref, h0_ref, wx_ref, wh_ref, bi_ref, wo_ref, bo_ref,
                   out_ref, hlast_ref, h_scratch):
    """One grid step == one RNN time step; hidden carried in VMEM scratch."""
    t = pl.program_id(0)

    # Load the initial hidden state into the carried scratch on step 0.
    @pl.when(t == 0)
    def _():
        h_scratch[...] = h0_ref[...]

    x = x_ref[0]                 # (Bp, I)
    h = h_scratch[...]           # (Bp, Hp)

    # hidden = cat(x, h) @ W_i2h^T + b_i2h  ==  x @ Wx + h @ Wh + b
    hidden = (
        jnp.dot(x, wx_ref[...], preferred_element_type=jnp.float32)
        + jnp.dot(h, wh_ref[...], preferred_element_type=jnp.float32)
        + bi_ref[...]
    )                            # (Bp, Hp)

    # logits = hidden @ W_h2o^T + b_h2o   (padded lanes get bias -1e30)
    logits = (
        jnp.dot(hidden, wo_ref[...], preferred_element_type=jnp.float32)
        + bo_ref[...]
    )                            # (Bp, Op)

    # Numerically-stable LogSoftmax along dim=1. Padded lanes underflow to
    # exp(...)=0, so the result on real lanes is exact.
    m = jnp.max(logits, axis=1, keepdims=True)
    shifted = logits - m
    lse = jnp.log(jnp.sum(jnp.exp(shifted), axis=1, keepdims=True))

    out_ref[0] = (shifted - lse).astype(out_ref.dtype)   # lane-dense 128-wide store
    h_scratch[...] = hidden                              # carry to next step

    @pl.when(t == pl.num_programs(0) - 1)
    def _():
        hlast_ref[...] = hidden.astype(hlast_ref.dtype)


def make_rnn_reference(w_i2h, b_i2h, w_h2o, b_h2o, input_size):
    """Prepare (once) the padded/transposed parameters and return
    (step_fn, sequence_fn):
        step_fn(x, h)        -> (log_probs (B, O), new_hidden (B, H))   [== module.forward]
        sequence_fn(xs, h0)  -> (log_probs (T, B, O), last_hidden (B, H))
    """
    H, IH = w_i2h.shape
    I = int(input_size)
    assert IH == I + H, "w_i2h must have shape (hidden, input + hidden)"
    O = w_h2o.shape[0]
    Hp = _round_up(H, LANE)
    Op = _round_up(O, LANE)

    # One-time weight preprocessing (hoisted out of the per-call path):
    # split the i2h weight into x/h parts, transpose for (B,K)@(K,N) matmuls,
    # and zero-pad the feature axes to 128 lanes for lane-dense compute/stores.
    wx = jnp.zeros((I, Hp), jnp.float32).at[:, :H].set(jnp.transpose(w_i2h[:, :I]))
    wh = jnp.zeros((Hp, Hp), jnp.float32).at[:H, :H].set(jnp.transpose(w_i2h[:, I:]))
    bi = jnp.zeros((1, Hp), jnp.float32).at[:, :H].set(b_i2h.reshape(1, H))
    wo = jnp.zeros((Hp, Op), jnp.float32).at[:H, :O].set(jnp.transpose(w_h2o))
    bo = jnp.full((1, Op), NEG_BIG, jnp.float32).at[:, :O].set(b_h2o.reshape(1, O))

    @jax.jit
    def sequence_fn(xs, h0):
        T, B, _ = xs.shape
        Bp = max(_round_up(B, SUBLANE), SUBLANE)

        # Pad batch to fill sublanes / MXU rows (exact zeros; sliced off below).
        xs_p = jnp.zeros((T, Bp, I), jnp.float32).at[:, :B, :].set(xs)
        h0_p = jnp.zeros((Bp, Hp), jnp.float32).at[:B, :H].set(h0)

        const = lambda t: (0, 0)   # weights / h0 / last-hidden stay resident in VMEM

        out_p, hlast_p = pl.pallas_call(
            rnn_seq_kernel,
            out_shape=(
                jax.ShapeDtypeStruct((T, Bp, Op), jnp.float32),
                jax.ShapeDtypeStruct((Bp, Hp), jnp.float32),
            ),
            grid_spec=pltpu.PrefetchScalarGridSpec(
                num_scalar_prefetch=0,
                grid=(T,),
                in_specs=[
                    pl.BlockSpec((1, Bp, I), lambda t: (t, 0, 0)),  # x_t streamed per step
                    pl.BlockSpec((Bp, Hp), const),                  # h0 (read at t==0)
                    pl.BlockSpec((I, Hp), const),                   # Wx  (resident)
                    pl.BlockSpec((Hp, Hp), const),                  # Wh  (resident)
                    pl.BlockSpec((1, Hp), const),                   # b_i2h
                    pl.BlockSpec((Hp, Op), const),                  # Wo  (resident)
                    pl.BlockSpec((1, Op), const),                   # b_h2o (+ -1e30 pad)
                ],
                out_specs=(
                    pl.BlockSpec((1, Bp, Op), lambda t: (t, 0, 0)),  # lane-dense log-probs
                    pl.BlockSpec((Bp, Hp), const),                   # final hidden
                ),
                scratch_shapes=[pltpu.VMEM((Bp, Hp), jnp.float32)],  # carried hidden state
            ),
            # Time axis is a sequential carry -> "arbitrary".
            # (On v7x one could add a leading "parallel" batch-block axis to use
            #  both TensorCores; at B=2 it is not worth it.)
            compiler_params=pltpu.CompilerParams(
                dimension_semantics=("arbitrary",),
            ),
        )(xs_p, h0_p, wx, wh, bi, wo, bo)

        return out_p[:, :B, :O], hlast_p[:B, :H]

    @jax.jit
    def step_fn(x, hidden):
        out, new_hidden = sequence_fn(x[None], hidden)
        return out[0], new_hidden

    return step_fn, sequence_fn


if __name__ == "__main__":
    batch = 2
    input_size = 16
    hidden_size = 32
    output_size = 8
    seq_len = 8

    key = jax.random.PRNGKey(0)
    kx, kxs, kh, kw1, kb1, kw2, kb2 = jax.random.split(key, 7)

    x = jax.random.normal(kx, (batch, input_size), dtype=jnp.float32)
    xs = jax.random.normal(kxs, (seq_len, batch, input_size), dtype=jnp.float32)
    h0 = jax.random.normal(kh, (batch, hidden_size), dtype=jnp.float32)

    # Parameter init matching nn.Linear shapes: weight (out, in), bias (out,).
    bound1 = 1.0 / jnp.sqrt(float(input_size + hidden_size))
    w_i2h = jax.random.uniform(kw1, (hidden_size, input_size + hidden_size),
                               minval=-bound1, maxval=bound1, dtype=jnp.float32)
    b_i2h = jax.random.uniform(kb1, (hidden_size,),
                               minval=-bound1, maxval=bound1, dtype=jnp.float32)
    bound2 = 1.0 / jnp.sqrt(float(hidden_size))
    w_h2o = jax.random.uniform(kw2, (output_size, hidden_size),
                               minval=-bound2, maxval=bound2, dtype=jnp.float32)
    b_h2o = jax.random.uniform(kb2, (output_size,),
                               minval=-bound2, maxval=bound2, dtype=jnp.float32)

    step_fn, sequence_fn = make_rnn_reference(w_i2h, b_i2h, w_h2o, b_h2o, input_size)

    # ---- Single step: exactly the PyTorch module's forward(input, hidden) ----
    out, new_hidden = step_fn(x, h0)
    jax.block_until_ready((out, new_hidden))

    combined = jnp.concatenate([x, h0], axis=1)
    ref_hidden = combined @ w_i2h.T + b_i2h
    ref_logits = ref_hidden @ w_h2o.T + b_h2o
    ref_out = jax.nn.log_softmax(ref_logits, axis=1)
    assert jnp.allclose(out, ref_out, atol=1e-5, rtol=1e-5), "log-softmax output mismatch"
    assert jnp.allclose(new_hidden, ref_hidden, atol=1e-5, rtol=1e-5), "hidden mismatch"

    # ---- Multi-step: whole sequence in ONE pallas_call (grid over time) ----
    outs_seq, h_last = sequence_fn(xs, h0)
    jax.block_until_ready((outs_seq, h_last))

    ref_h = h0
    ref_outs = []
    for t in range(seq_len):
        comb = jnp.concatenate([xs[t], ref_h], axis=1)
        ref_h = comb @ w_i2h.T + b_i2h
        lg = ref_h @ w_h2o.T + b_h2o
        ref_outs.append(jax.nn.log_softmax(lg, axis=1))
    ref_outs = jnp.stack(ref_outs)
    assert jnp.allclose(outs_seq, ref_outs, atol=1e-4, rtol=1e-4), "sequence output mismatch"
    assert jnp.allclose(h_last, ref_h, atol=1e-4, rtol=1e-4), "sequence hidden mismatch"

    print("KERNEL_OK")
</pallas_src>

<mosaic_0001>
module attributes {stable_mosaic.version = 11 : i64} {
  func.func @rnn_seq_kernel(%arg0: i32, %arg1: memref<1x8x16xf32, #tpu.memory_space<vmem>>, %arg2: memref<8x128xf32, #tpu.memory_space<vmem>>, %arg3: memref<16x128xf32, #tpu.memory_space<vmem>>, %arg4: memref<128x128xf32, #tpu.memory_space<vmem>>, %arg5: memref<1x128xf32, #tpu.memory_space<vmem>>, %arg6: memref<128x128xf32, #tpu.memory_space<vmem>>, %arg7: memref<1x128xf32, #tpu.memory_space<vmem>>, %arg8: memref<1x8x128xf32, #tpu.memory_space<vmem>>, %arg9: memref<8x128xf32, #tpu.memory_space<vmem>>, %arg10: memref<8x128xf32, #tpu.memory_space<vmem>>) attributes {dimension_semantics = [#tpu.dimension_semantics<arbitrary>], iteration_bounds = array<i64: 1>, scalar_prefetch = 0 : i64, scratch_operands = 1 : i64, tpu.core_type = #tpu.core_type<tc>, window_params = [{transform_indices = @transform_0, window_bounds = array<i64: 1, 8, 16>}, {pipeline_mode = #tpu.pipeline_mode<synchronous>, transform_indices = @transform_1, window_bounds = array<i64: 8, 128>}, {pipeline_mode = #tpu.pipeline_mode<synchronous>, transform_indices = @transform_2, window_bounds = array<i64: 16, 128>}, {pipeline_mode = #tpu.pipeline_mode<synchronous>, transform_indices = @transform_3, window_bounds = array<i64: 128, 128>}, {pipeline_mode = #tpu.pipeline_mode<synchronous>, transform_indices = @transform_4, window_bounds = array<i64: 1, 128>}, {pipeline_mode = #tpu.pipeline_mode<synchronous>, transform_indices = @transform_5, window_bounds = array<i64: 128, 128>}, {pipeline_mode = #tpu.pipeline_mode<synchronous>, transform_indices = @transform_6, window_bounds = array<i64: 1, 128>}, {transform_indices = @transform_7, window_bounds = array<i64: 1, 8, 128>}, {pipeline_mode = #tpu.pipeline_mode<synchronous>, transform_indices = @transform_8, window_bounds = array<i64: 8, 128>}]} {
    %c0_i32 = arith.constant 0 : i32
    %0 = arith.cmpi eq, %arg0, %c0_i32 : i32
    %1 = arith.extui %0 : i1 to i32
    %c0_i32_0 = arith.constant 0 : i32
    %2 = arith.cmpi ne, %1, %c0_i32_0 : i32
    scf.if %2 {
      %c0_26 = arith.constant 0 : index
      %c0_27 = arith.constant 0 : index
      %36 = vector.load %arg2[%c0_26, %c0_27] : memref<8x128xf32, #tpu.memory_space<vmem>>, vector<8x128xf32>
      %c0_28 = arith.constant 0 : index
      %c0_29 = arith.constant 0 : index
      %37 = vector.load %arg10[%c0_28, %c0_29] : memref<8x128xf32, #tpu.memory_space<vmem>>, vector<8x128xf32>
      tpu.vector_store %arg10[%c0_28, %c0_29], %36 {strides = array<i32>} : memref<8x128xf32, #tpu.memory_space<vmem>>, vector<8x128xf32>,
    } else {
    }
    %c0 = arith.constant 0 : index
    %c0_1 = arith.constant 0 : index
    %c0_2 = arith.constant 0 : index
    %3 = vector.load %arg1[%c0, %c0_1, %c0_2] : memref<1x8x16xf32, #tpu.memory_space<vmem>>, vector<1x8x16xf32>
    %4 = vector.shape_cast %3 : vector<1x8x16xf32> to vector<8x16xf32>
    %c0_3 = arith.constant 0 : index
    %c0_4 = arith.constant 0 : index
    %5 = vector.load %arg10[%c0_3, %c0_4] : memref<8x128xf32, #tpu.memory_space<vmem>>, vector<8x128xf32>
    %c0_5 = arith.constant 0 : index
    %c0_6 = arith.constant 0 : index
    %6 = vector.load %arg3[%c0_5, %c0_6] : memref<16x128xf32, #tpu.memory_space<vmem>>, vector<16x128xf32>
    %cst = arith.constant dense<0.000000e+00> : vector<8x128xf32>
    %7 = tpu.matmul %4, %6, %cst {dimension_numbers = #tpu.dot_dimension_numbers<[1], [0], [0], [1], [0, 0, 1, 1], [], []>} : vector<8x16xf32>, vector<16x128xf32>, vector<8x128xf32> -> vector<8x128xf32>
    %c0_7 = arith.constant 0 : index
    %c0_8 = arith.constant 0 : index
    %8 = vector.load %arg4[%c0_7, %c0_8] : memref<128x128xf32, #tpu.memory_space<vmem>>, vector<128x128xf32>
    %cst_9 = arith.constant dense<0.000000e+00> : vector<8x128xf32>
    %9 = tpu.matmul %5, %8, %cst_9 {dimension_numbers = #tpu.dot_dimension_numbers<[1], [0], [0], [1], [0, 0, 1, 1], [], []>} : vector<8x128xf32>, vector<128x128xf32>, vector<8x128xf32> -> vector<8x128xf32>
    %10 = arith.addf %7, %9 : vector<8x128xf32>
    %c0_10 = arith.constant 0 : index
    %c0_11 = arith.constant 0 : index
    %11 = vector.load %arg5[%c0_10, %c0_11] : memref<1x128xf32, #tpu.memory_space<vmem>>, vector<1x128xf32>
    %12 = vector.broadcast %11 : vector<1x128xf32> to vector<8x128xf32>
    %13 = arith.addf %10, %12 : vector<8x128xf32>
    %c0_12 = arith.constant 0 : index
    %c0_13 = arith.constant 0 : index
    %14 = vector.load %arg6[%c0_12, %c0_13] : memref<128x128xf32, #tpu.memory_space<vmem>>, vector<128x128xf32>
    %cst_14 = arith.constant dense<0.000000e+00> : vector<8x128xf32>
    %15 = tpu.matmul %13, %14, %cst_14 {dimension_numbers = #tpu.dot_dimension_numbers<[1], [0], [0], [1], [0, 0, 1, 1], [], []>} : vector<8x128xf32>, vector<128x128xf32>, vector<8x128xf32> -> vector<8x128xf32>
    %c0_15 = arith.constant 0 : index
    %c0_16 = arith.constant 0 : index
    %16 = vector.load %arg7[%c0_15, %c0_16] : memref<1x128xf32, #tpu.memory_space<vmem>>, vector<1x128xf32>
    %17 = vector.broadcast %16 : vector<1x128xf32> to vector<8x128xf32>
    %18 = arith.addf %15, %17 : vector<8x128xf32>
    %cst_17 = arith.constant dense<0xFF800000> : vector<8xf32>
    %19 = vector.multi_reduction <maximumf>, %18, %cst_17 [1] : vector<8x128xf32> to vector<8xf32>
    %20 = vector.shape_cast %19 : vector<8xf32> to vector<8x1xf32>
    %21 = vector.broadcast %20 : vector<8x1xf32> to vector<8x128xf32>
    %22 = arith.subf %18, %21 : vector<8x128xf32>
    %23 = math.exp %22 : vector<8x128xf32>
    %cst_18 = arith.constant dense<0.000000e+00> : vector<8xf32>
    %24 = vector.multi_reduction <add>, %23, %cst_18 [1] : vector<8x128xf32> to vector<8xf32>
    %25 = vector.shape_cast %24 : vector<8xf32> to vector<8x1xf32>
    %26 = math.log %25 : vector<8x1xf32>
    %27 = vector.broadcast %26 : vector<8x1xf32> to vector<8x128xf32>
    %28 = arith.subf %22, %27 : vector<8x128xf32>
    %c0_19 = arith.constant 0 : index
    %c0_20 = arith.constant 0 : index
    %c0_21 = arith.constant 0 : index
    %29 = vector.load %arg8[%c0_19, %c0_20, %c0_21] : memref<1x8x128xf32, #tpu.memory_space<vmem>>, vector<1x8x128xf32>
    %30 = vector.shape_cast %29 : vector<1x8x128xf32> to vector<8x128xf32>
    %31 = vector.shape_cast %28 : vector<8x128xf32> to vector<1x8x128xf32>
    tpu.vector_store %arg8[%c0_19, %c0_20, %c0_21], %31 {strides = array<i32>} : memref<1x8x128xf32, #tpu.memory_space<vmem>>, vector<1x8x128xf32>,
    %c0_22 = arith.constant 0 : index
    %c0_23 = arith.constant 0 : index
    %32 = vector.load %arg10[%c0_22, %c0_23] : memref<8x128xf32, #tpu.memory_space<vmem>>, vector<8x128xf32>
    tpu.vector_store %arg10[%c0_22, %c0_23], %13 {strides = array<i32>} : memref<8x128xf32, #tpu.memory_space<vmem>>, vector<8x128xf32>,
    %c0_i32_24 = arith.constant 0 : i32
    %33 = arith.cmpi eq, %arg0, %c0_i32_24 : i32
    %34 = arith.extui %33 : i1 to i32
    %c0_i32_25 = arith.constant 0 : i32
    %35 = arith.cmpi ne, %34, %c0_i32_25 : i32
    scf.if %35 {
      %c0_26 = arith.constant 0 : index
      %c0_27 = arith.constant 0 : index
      %36 = vector.load %arg9[%c0_26, %c0_27] : memref<8x128xf32, #tpu.memory_space<vmem>>, vector<8x128xf32>
      tpu.vector_store %arg9[%c0_26, %c0_27], %13 {strides = array<i32>} : memref<8x128xf32, #tpu.memory_space<vmem>>, vector<8x128xf32>,
    } else {
    }
    return
  }
  func.func @transform_0(%arg0: i32) -> (i32, i32, i32) {
    %c0_i32 = arith.constant 0 : i32
    %c0_i32_0 = arith.constant 0 : i32
    %c0_i32_1 = arith.constant 0 : i32
    return %arg0, %c0_i32, %c0_i32_0 : i32, i32, i32
  }
  func.func @transform_1(%arg0: i32) -> (i32, i32) {
    %c0_i32 = arith.constant 0 : i32
    %c0_i32_0 = arith.constant 0 : i32
    %c0_i32_1 = arith.constant 0 : i32
    return %c0_i32, %c0_i32_0 : i32, i32
  }
  func.func @transform_2(%arg0: i32) -> (i32, i32) {
    %c0_i32 = arith.constant 0 : i32
    %c0_i32_0 = arith.constant 0 : i32
    %c0_i32_1 = arith.constant 0 : i32
    return %c0_i32, %c0_i32_0 : i32, i32
  }
  func.func @transform_3(%arg0: i32) -> (i32, i32) {
    %c0_i32 = arith.constant 0 : i32
    %c0_i32_0 = arith.constant 0 : i32
    %c0_i32_1 = arith.constant 0 : i32
    return %c0_i32, %c0_i32_0 : i32, i32
  }
  func.func @transform_4(%arg0: i32) -> (i32, i32) {
    %c0_i32 = arith.constant 0 : i32
    %c0_i32_0 = arith.constant 0 : i32
    %c0_i32_1 = arith.constant 0 : i32
    return %c0_i32, %c0_i32_0 : i32, i32
  }
  func.func @transform_5(%arg0: i32) -> (i32, i32) {
    %c0_i32 = arith.constant 0 : i32
    %c0_i32_0 = arith.constant 0 : i32
    %c0_i32_1 = arith.constant 0 : i32
    return %c0_i32, %c0_i32_0 : i32, i32
  }
  func.func @transform_6(%arg0: i32) -> (i32, i32) {
    %c0_i32 = arith.constant 0 : i32
    %c0_i32_0 = arith.constant 0 : i32
    %c0_i32_1 = arith.constant 0 : i32
    return %c0_i32, %c0_i32_0 : i32, i32
  }
  func.func @transform_7(%arg0: i32) -> (i32, i32, i32) {
    %c0_i32 = arith.constant 0 : i32
    %c0_i32_0 = arith.constant 0 : i32
    %c0_i32_1 = arith.constant 0 : i32
    return %arg0, %c0_i32, %c0_i32_0 : i32, i32, i32
  }
  func.func @transform_8(%arg0: i32) -> (i32, i32) {
    %c0_i32 = arith.constant 0 : i32
    %c0_i32_0 = arith.constant 0 : i32
    %c0_i32_1 = arith.constant 0 : i32
    return %c0_i32, %c0_i32_0 : i32, i32
  }
}

</mosaic_0001>

<bundles_post_ra>
// kernel: sequence_fn.1
= control target key start
LH: loop header
LB: loop body
LE: loop exit
PB: predicated region body
PF: predicated region fallthrough
CT: control target
= control target key end

     0   :  { %14 = vsyncpa [#allocation4], 0  ;;  %s343_s0 = inlined_call_operand.vmem [shape: f32[1,8,16], index: 0, kind: input, shape index: {}]   ;;  %s344_s1 = inlined_call_operand.vmem [shape: f32[8,128], index: 1, kind: input, shape index: {}]   ;;  %s345_s2 = inlined_call_operand.vmem [shape: f32[16,128], index: 2, kind: input, shape index: {}]   ;;  %s346_s3 = inlined_call_operand.hbm [shape: f32[128,128], index: 3, kind: input, shape index: {}]   ;;  %s347_s4 = inlined_call_operand.vmem [shape: f32[1,128], index: 4, kind: input, shape index: {}]   ;;  %s348_s5 = inlined_call_operand.hbm [shape: f32[128,128], index: 5, kind: input, shape index: {}]   ;;  %s349_s6 = inlined_call_operand.vmem [shape: f32[1,128], index: 6, kind: input, shape index: {}]   ;;  %s350_s7 = inlined_call_operand.vmem [shape: f32[1,8,128], index: 7, kind: output, shape index: {0}]   ;;  %s351_s8 = inlined_call_operand.vmem [shape: f32[8,128], index: 8, kind: output, shape index: {1}]  }
   0x1   :  { %s26_s29 = sshll.u32 %s346_s3, 4  ;;  %s27_s29 = int_to_ptr.hbm [resolvable:$true] %s26_s29 }
   0x2   :  { %15 = vsyncpa [#allocation6], 0  ;;  %s264_s30 = smov [#allocation3]   ;;  %s41_s12 = sshll.u32 %s348_s5, 4  ;;  %s42_s12 = int_to_ptr.hbm [resolvable:$true] %s41_s12 }
   0x3   :  { %s28_s9 = sshll.u32 %s264_s30, 4  ;;  %s265_s13 = smov 128   ;;  %s29_s9 = int_to_ptr.vmem [resolvable:$true] %s28_s9 }
   0x4   :  { %s266_s14 = smov 8   ;;  %s267_s15 = smov [#allocation5]  }
   0x5   :  { %34 = dma.hbm_to_vmem [thread:$0]  %s27_s29, 2048, %s29_s9, [#allocation4], %s265_s13, %s265_s13, %s266_s14  }
   0x6   :  { %s43_s16 = sshll.u32 %s267_s15, 4  ;;  %s44_s16 = int_to_ptr.vmem [resolvable:$true] %s43_s16 }
   0x7   :  { %49 = dma.hbm_to_vmem [thread:$0]  %s42_s12, 2048, %s44_s16, [#allocation6], %s265_s13, %s265_s13, %s266_s14  }
   0x8   :  { %260 = dma.done.wait [#allocation4], 2048  }
   0x9   :  { %261 = vsyncadd [#allocation4], 4294965248 }
   0xa   :  { %262 = dma.done.wait [#allocation6], 2048  }
   0xb   :  { %263 = vsyncadd [#allocation6], 4294965248  ;;  %v85_v0 = vld [vmem:[#allocation3 + $0x78] sm:$0xff]  ;;  %v84_v1 = vld [vmem:[#allocation3 + $0x70] sm:$0xff]  ;;  %vm106_vm0 = vcmask 130048  }
   0xc   :  { %86 = vmatpush.msra.mxu0 %v85_v0  ;;  %v83_v2 = vld [vmem:[#allocation3 + $0x68] sm:$0xff]  ;;  %v82_v3 = vld [vmem:[#allocation3 + $0x60] sm:$0xff]  ;;  %v81_v6 = vld [vmem:[#allocation3 + $0x58] sm:$0xff] }
   0xd   :  { %v69_v4 = vld [vmem:[%s345_s2 + $0x8] sm:$0xff]  ;;  %v68_v5 = vld [vmem:[%s345_s2] sm:$0xff]  ;;  %v150_v8 = vld [vmem:[#allocation5 + $0x78] sm:$0xff] }
   0xe   :  { %87 = vmatpush.msra.mxu0 %v84_v1  ;;  %124 = vmatpush.msra.mxu1 %v69_v4  ;;  %v66_v7 = vld [vmem:[%s343_s0] sm:$0xff]  ;;  %v149_v9 = vld [vmem:[#allocation5 + $0x70] sm:$0xff]  ;;  %v148_v11 = vld [vmem:[#allocation5 + $0x68] sm:$0xff] }
   0xf   :  { %155 = vmatpush.msra.mxu2 %v150_v8  ;;  %v80_v10 = vld [vmem:[#allocation3 + $0x50] sm:$0xff]  ;;  %v79_v12 = vld [vmem:[#allocation3 + $0x48] sm:$0xff]  ;;  %v147_v13 = vld [vmem:[#allocation5 + $0x60] sm:$0xff] }
  0x10   :  { %88 = vmatpush.msra.mxu0 %v83_v2  ;;  %125 = vmatpush.msra.mxu1 %v68_v5  ;;  %v78_v14 = vld [vmem:[#allocation3 + $0x40] sm:$0xff]  ;;  %v146_v15 = vld [vmem:[#allocation5 + $0x58] sm:$0xff]  ;;  %v145_v17 = vld [vmem:[#allocation5 + $0x50] sm:$0xff] }
  0x11   :  { %201 = vmatmul.msk.f32.vlgmr.msra.gmra.mxu1 %vm106_vm0, %v66_v7  ;;  %156 = vmatpush.msra.mxu2 %v149_v9  ;;  %v77_v16 = vld [vmem:[#allocation3 + $0x38] sm:$0xff]  ;;  %v76_v18 = vld [vmem:[#allocation3 + $0x30] sm:$0xff]  ;;  %v144_v19 = vld [vmem:[#allocation5 + $0x48] sm:$0xff] }
  0x12   :  { %89 = vmatpush.msra.mxu0 %v82_v3  ;;  %v75_v20 = vld [vmem:[#allocation3 + $0x28] sm:$0xff]  ;;  %v143_v21 = vld [vmem:[#allocation5 + $0x40] sm:$0xff]  ;;  %v142_v23 = vld [vmem:[#allocation5 + $0x38] sm:$0xff] }
  0x13   :  { %157 = vmatpush.msra.mxu2 %v148_v11  ;;  %v74_v22 = vld [vmem:[#allocation3 + $0x20] sm:$0xff]  ;;  %v73_v24 = vld [vmem:[#allocation3 + $0x18] sm:$0xff]  ;;  %v141_v25 = vld [vmem:[#allocation5 + $0x30] sm:$0xff] }
  0x14   :  { %90 = vmatpush.msra.mxu0 %v81_v6  ;;  %v72_v26 = vld [vmem:[#allocation3 + $0x10] sm:$0xff]  ;;  %v140_v27 = vld [vmem:[#allocation5 + $0x28] sm:$0xff]  ;;  %v139_v29 = vld [vmem:[#allocation5 + $0x20] sm:$0xff] }
  0x15   :  { %158 = vmatpush.msra.mxu2 %v147_v13  ;;  %v71_v28 = vld [vmem:[#allocation3 + $0x8] sm:$0xff]  ;;  %v70_v30 = vld [vmem:[#allocation3] sm:$0xff]  ;;  %v138_v32 = vld [vmem:[#allocation5 + $0x18] sm:$0xff] }
  0x16   :  { %91 = vmatpush.msra.mxu0 %v80_v10  ;;  %v64_v31 = vld [vmem:[%s344_s1] sm:$0xff]  ;;  %v137_v33 = vld [vmem:[#allocation5 + $0x10] sm:$0xff]  ;;  %v136_v34 = vld [vmem:[#allocation5 + $0x8] sm:$0xff] }
  0x17   :  { %159 = vmatpush.msra.mxu2 %v146_v15  ;;  %v135_v35 = vld [vmem:[#allocation5] sm:$0xff] }
  0x18   :  { %92 = vmatpush.msra.mxu0 %v79_v12  ;;  %v206_v37 = vld [vmem:[%s347_s4] ss:$0 sm:$0xff] }
  0x19   :  { %160 = vmatpush.msra.mxu2 %v145_v17  ;;  %v207_v41 = vld [vmem:[%s349_s6] ss:$0 sm:$0xff] }
  0x1a   :  { %93 = vmatpush.msra.mxu0 %v78_v14 }
  0x1b   :  { %161 = vmatpush.msra.mxu2 %v144_v19 }
  0x1c   :  { %94 = vmatpush.msra.mxu0 %v77_v16 }
  0x1d   :  { %162 = vmatpush.msra.mxu2 %v143_v21 }
  0x1e   :  { %95 = vmatpush.msra.mxu0 %v76_v18 }
  0x1f   :  { %163 = vmatpush.msra.mxu2 %v142_v23 }
  0x20   :  { %96 = vmatpush.msra.mxu0 %v75_v20 }
  0x21   :  { %164 = vmatpush.msra.mxu2 %v141_v25 }
  0x22   :  { %97 = vmatpush.msra.mxu0 %v74_v22 }
  0x23   :  { %165 = vmatpush.msra.mxu2 %v140_v27 }
  0x24   :  { %98 = vmatpush.msra.mxu0 %v73_v24 }
  0x25   :  { %166 = vmatpush.msra.mxu2 %v139_v29 }
  0x26   :  { %99 = vmatpush.msra.mxu0 %v72_v26 }
  0x27   :  { %167 = vmatpush.msra.mxu2 %v138_v32 }
  0x28   :  { %100 = vmatpush.msra.mxu0 %v71_v28 }
  0x29   :  { %168 = vmatpush.msra.mxu2 %v137_v33 }
  0x2a   :  { %101 = vmatpush.msra.mxu0 %v70_v30 }
  0x2b   :  { %102 = vmatmul.f32.vlgmr.msra.gmra.mxu0 %v64_v31  ;;  %169 = vmatpush.msra.mxu2 %v136_v34 }
  0x2d   :  { %170 = vmatpush.msra.mxu2 %v135_v35 }
  0x8e   :  { %v127_v36 = vpop.f32.mrf.mxu1 }
  0xa8   :  { %v103_v38 = vpop.f32.mrf.mxu0 }
  0xa9   :  { %v128_v39 = vadd.f32 %v127_v36, %v103_v38 }
  0xab   :  { %v134_v40 = vadd.f32 %v206_v37, %v128_v39 }
  0xad   :  { %171 = vmatmul.f32.vlgmr.msra.gmra.mxu2 %v134_v40  ;;  %190 = vst [vmem:[%s351_s8] sm:$0xff] %v134_v40 }
 0x130   :  { %v172_v42 = vpop.f32.mrf.mxu2 }
 0x131   :  { %v173_v43 = vadd.f32 %v207_v41, %v172_v42 }
 0x133   :  { %175 = vmax.xlane.f32.xlu0 %v173_v43 }
 0x1a6   :  { %v176_v44 = vpop.xlane.xlu0 %175 }
 0x1a7   :  { %v177_v45 = vsub.f32 %v173_v43, %v176_v44 }
 0x1a9   :  { %v178_v46 = vmul.f32 1.442695, %v177_v45 }
 0x1ab   :  { %208 = vpow2.f32 %v178_v46 }
 0x1b1   :  { %v209_v47 = vpop.eup %208 }
 0x1b2   :  { %180 = vadd.xlane.f32.xlu0 %v209_v47 }
 0x225   :  { %v181_v48 = vpop.xlane.xlu0 %180 }
 0x226   :  { %210 = vlog2.f32 %v181_v48 }
 0x22c   :  { %v211_v49 = vpop.eup %210 }
 0x22d   :  { %v183_v50 = vmul.f32 0.6931472, %v211_v49 }
 0x22f   :  { %v184_v51 = vsub.f32 %v177_v45, %v183_v50 }
 0x231   :  { %185 = vst [vmem:[%s350_s7] sm:$0xff] %v184_v51 }
 0x232   :  { %199 = vsyncpa [#allocation4], 1 }
 0x233   :  { %200 = vsyncpa [#allocation6], 1 }

</bundles_post_ra>
